<compile_context>
chip_gen: v6e
topology: v6e:2x2x1
jax: 0.10.0
libtpu: 0.0.40
codegen_flags: <defaults>
</compile_context>

<pallas_src>
import jax
import jax.numpy as jnp
from jax.experimental import pallas as pl
from jax.experimental.pallas import tpu as pltpu


# ----------------------------- kernels ---------------------------------------


def proj_kernel(x_ref, w1_ref, wfa_ref, wfb_ref, wfc_ref, out_ref, p_ref):
    """Per-row-tile: h = ReLU(x@W1p); self term h@Wa; panels h@Wb, h@Wc."""
    h = jnp.maximum(
        jnp.dot(x_ref[...], w1_ref[...], preferred_element_type=jnp.float32),
        0.0,
    )
    # Self contribution (goes straight into the stage-2 accumulator init).
    out_ref[...] = jnp.dot(h, wfa_ref[...], preferred_element_type=jnp.float32)
    # Projection panels consumed by the 1-hop / 2-hop adjacency matmuls.
    p1 = jnp.dot(h, wfb_ref[...], preferred_element_type=jnp.float32)
    p2 = jnp.dot(h, wfc_ref[...], preferred_element_type=jnp.float32)
    p_ref[0] = p1.astype(p_ref.dtype)
    p_ref[1] = p2.astype(p_ref.dtype)


def agg_kernel(init_ref, a_ref, p_ref, out_ref, acc_ref):
    """out[i] = init[i] + sum_k A_cat[i,k] @ p_cat[k]   (f32 accumulator)."""
    k = pl.program_id(1)

    @pl.when(k == 0)
    def _():
        acc_ref[...] = init_ref[...]

    acc_ref[...] += jnp.dot(
        a_ref[...], p_ref[...], preferred_element_type=jnp.float32
    )

    @pl.when(k == pl.num_programs(1) - 1)
    def _():
        out_ref[...] = acc_ref[...].astype(out_ref.dtype)


# ----------------------------- wrapper ----------------------------------------


def _round_up(v, m):
    return (v + m - 1) // m * m


def h2gcn_forward(x, w1_t, a1, a2, wf_t, *, tile=None, adj_dtype=jnp.bfloat16):
    """x:[N,m], w1_t:[m,hidden], a1/a2:[N,N], wf_t:[3*hidden,m_y] -> [N,m_y]."""
    N, m = x.shape
    hidden = w1_t.shape[1]
    m_y = wf_t.shape[1]
    assert wf_t.shape[0] == 3 * hidden

    LANE = 128
    myp = _round_up(m_y, LANE)            # lane-dense output width
    hp = _round_up(hidden, LANE)          # lane-dense hidden width
    if tile is None:
        # 512 works on v7x (64 MiB VMEM) and v5e/v6e; shrink for tiny graphs.
        tile = min(512, _round_up(N, LANE))
    assert tile % LANE == 0
    n_pad = _round_up(N, tile)

    f32 = jnp.float32
    # Zero-pad operands (padded rows/cols contribute exactly zero).
    x_p = jnp.zeros((n_pad, m), f32).at[:N, :].set(x.astype(f32))
    w1_p = jnp.zeros((m, hp), f32).at[:, :hidden].set(w1_t.astype(f32))

    def pad_slab(s):
        return jnp.zeros((hp, myp), f32).at[:hidden, :m_y].set(s.astype(f32))

    wfa = pad_slab(wf_t[:hidden])            # multiplies h
    wfb = pad_slab(wf_t[hidden:2 * hidden])  # multiplies A1 @ h
    wfc = pad_slab(wf_t[2 * hidden:])        # multiplies A2 @ h

    # A_cat = [A1 | A2] (bf16), so one matmul does A1@p1 + A2@p2.
    a_cat = jnp.zeros((n_pad, 2 * n_pad), adj_dtype)
    a_cat = a_cat.at[:N, :N].set(a1.astype(adj_dtype))
    a_cat = a_cat.at[:N, n_pad:n_pad + N].set(a2.astype(adj_dtype))

    tm = tile
    tk = tile

    # ---- stage 1: projections (tiny; row-tiled, parallel) ----
    out_init, p_cat = pl.pallas_call(
        proj_kernel,
        out_shape=(
            jax.ShapeDtypeStruct((n_pad, myp), f32),
            jax.ShapeDtypeStruct((2, n_pad, myp), adj_dtype),
        ),
        grid_spec=pltpu.PrefetchScalarGridSpec(
            num_scalar_prefetch=0,
            grid=(n_pad // tm,),
            in_specs=[
                pl.BlockSpec((tm, m), lambda i: (i, 0)),
                pl.BlockSpec((m, hp), lambda i: (0, 0)),
                pl.BlockSpec((hp, myp), lambda i: (0, 0)),
                pl.BlockSpec((hp, myp), lambda i: (0, 0)),
                pl.BlockSpec((hp, myp), lambda i: (0, 0)),
            ],
            out_specs=(
                pl.BlockSpec((tm, myp), lambda i: (i, 0)),
                pl.BlockSpec((2, tm, myp), lambda i: (0, i, 0)),
            ),
        ),
        compiler_params=pltpu.CompilerParams(
            dimension_semantics=("parallel",)),
    )(x_p, w1_p, wfa, wfb, wfc)

    # [p1 ; p2] stacked along rows -> matches A_cat column blocks.
    p_flat = p_cat.reshape(2 * n_pad, myp)

    # ---- stage 2: tiled adjacency aggregation (the hot loop) ----
    out_p = pl.pallas_call(
        agg_kernel,
        out_shape=jax.ShapeDtypeStruct((n_pad, myp), f32),
        grid_spec=pltpu.PrefetchScalarGridSpec(
            num_scalar_prefetch=0,
            grid=(n_pad // tm, (2 * n_pad) // tk),
            in_specs=[
                pl.BlockSpec((tm, myp), lambda i, k: (i, 0)),   # self term
                pl.BlockSpec((tm, tk), lambda i, k: (i, k)),    # A_cat tile
                pl.BlockSpec((tk, myp), lambda i, k: (k, 0)),   # panel tile
            ],
            out_specs=pl.BlockSpec((tm, myp), lambda i, k: (i, 0)),
            scratch_shapes=[pltpu.VMEM((tm, myp), jnp.float32)],
        ),
        compiler_params=pltpu.CompilerParams(
            dimension_semantics=("parallel", "arbitrary")),
    )(out_init, a_cat, p_flat)

    return out_p[:N, :m_y]


# ------------------- glue: graph + params (plain JAX) -------------------------


def build_normalized_adjs(edge_index, num_nodes):
    """Dense reimplementation of the __init__ adjacency pipeline."""
    src, dst = edge_index
    adj = jnp.zeros((num_nodes, num_nodes), jnp.float32).at[src, dst].set(1.0)
    # remove_self_loops
    adj = adj * (1.0 - jnp.eye(num_nodes, dtype=jnp.float32))
    # 2-hop: A @ A, drop diagonal
    adj2 = adj @ adj
    adj2 = adj2 * (1.0 - jnp.eye(num_nodes, dtype=jnp.float32))
    # indicator_adj: binarize
    adj = (adj > 0).astype(jnp.float32)
    adj2 = (adj2 > 0).astype(jnp.float32)

    def sym_norm(a):
        deg = a.sum(axis=1)
        d_inv_sqrt = jnp.where(deg > 0, 1.0 / jnp.sqrt(deg), 0.0)
        return d_inv_sqrt[:, None] * a * d_inv_sqrt[None, :]

    return sym_norm(adj), sym_norm(adj2)


if __name__ == "__main__":
    key = jax.random.PRNGKey(0)
    N, m, hidden, m_y = 64, 16, 32, 8
    num_layers = 1
    final_in = (2 ** (num_layers + 1) - 1) * hidden  # 3 * hidden

    k_x, k_e, k_w1, k_wf = jax.random.split(key, 4)

    # synthetic graph: ring edges + random edges (symmetrized)
    ring_src = jnp.arange(N, dtype=jnp.int32)
    ring_dst = (ring_src + 1) % N
    rnd_src = jax.random.randint(k_e, (2 * N,), 0, N, dtype=jnp.int32)
    rnd_dst = jax.random.randint(
        jax.random.fold_in(k_e, 1), (2 * N,), 0, N, dtype=jnp.int32)
    src = jnp.concatenate([ring_src, ring_dst, rnd_src, rnd_dst])
    dst = jnp.concatenate([ring_dst, ring_src, rnd_dst, rnd_src])
    edge_index = (src, dst)

    a1, a2 = build_normalized_adjs(edge_index, N)

    # deterministic parameter init (Linear with bias=False)
    x = jax.random.normal(k_x, (N, m), jnp.float32)
    bound1 = 1.0 / jnp.sqrt(m)
    w1 = jax.random.uniform(k_w1, (hidden, m), jnp.float32, -bound1, bound1)
    boundf = 1.0 / jnp.sqrt(final_in)
    wf = jax.random.uniform(k_wf, (m_y, final_in), jnp.float32, -boundf, boundf)

    out = h2gcn_forward(x, w1.T, a1, a2, wf.T)
    out = jax.block_until_ready(out)

    # sanity check against plain-JAX f32 reference (kernel streams the
    # adjacencies / projection panel in bf16, so tolerance is loosened).
    h = jnp.maximum(x @ w1.T, 0.0)
    ref = jnp.concatenate([h, a1 @ h, a2 @ h], axis=1) @ wf.T
    assert out.shape == (N, m_y)
    assert jnp.allclose(out, ref, atol=2e-2, rtol=2e-2)

    print("KERNEL_OK")
</pallas_src>

<mosaic_0001>
module attributes {stable_mosaic.version = 11 : i64} {
  func.func @proj_kernel(%arg0: i32, %arg1: memref<128x16xf32, #tpu.memory_space<vmem>>, %arg2: memref<16x128xf32, #tpu.memory_space<vmem>>, %arg3: memref<128x128xf32, #tpu.memory_space<vmem>>, %arg4: memref<128x128xf32, #tpu.memory_space<vmem>>, %arg5: memref<128x128xf32, #tpu.memory_space<vmem>>, %arg6: memref<128x128xf32, #tpu.memory_space<vmem>>, %arg7: memref<2x128x128xbf16, #tpu.memory_space<vmem>>) attributes {dimension_semantics = [#tpu.dimension_semantics<parallel>], iteration_bounds = array<i64: 1>, scalar_prefetch = 0 : i64, scratch_operands = 0 : i64, tpu.core_type = #tpu.core_type<tc>, window_params = [{transform_indices = @transform_0, window_bounds = array<i64: 128, 16>}, {pipeline_mode = #tpu.pipeline_mode<synchronous>, transform_indices = @transform_1, window_bounds = array<i64: 16, 128>}, {pipeline_mode = #tpu.pipeline_mode<synchronous>, transform_indices = @transform_2, window_bounds = array<i64: 128, 128>}, {pipeline_mode = #tpu.pipeline_mode<synchronous>, transform_indices = @transform_3, window_bounds = array<i64: 128, 128>}, {pipeline_mode = #tpu.pipeline_mode<synchronous>, transform_indices = @transform_4, window_bounds = array<i64: 128, 128>}, {transform_indices = @transform_5, window_bounds = array<i64: 128, 128>}, {transform_indices = @transform_6, window_bounds = array<i64: 2, 128, 128>}]} {
    %c0 = arith.constant 0 : index
    %c0_0 = arith.constant 0 : index
    %0 = vector.load %arg1[%c0, %c0_0] : memref<128x16xf32, #tpu.memory_space<vmem>>, vector<128x16xf32>
    %c0_1 = arith.constant 0 : index
    %c0_2 = arith.constant 0 : index
    %1 = vector.load %arg2[%c0_1, %c0_2] : memref<16x128xf32, #tpu.memory_space<vmem>>, vector<16x128xf32>
    %cst = arith.constant dense<0.000000e+00> : vector<128x128xf32>
    %2 = tpu.matmul %0, %1, %cst {dimension_numbers = #tpu.dot_dimension_numbers<[1], [0], [0], [1], [0, 0, 1, 1], [], []>} : vector<128x16xf32>, vector<16x128xf32>, vector<128x128xf32> -> vector<128x128xf32>
    %cst_3 = arith.constant 0.000000e+00 : f32
    %3 = vector.broadcast %cst_3 : f32 to vector<128x128xf32>
    %4 = arith.maximumf %2, %3 : vector<128x128xf32>
    %c0_4 = arith.constant 0 : index
    %c0_5 = arith.constant 0 : index
    %5 = vector.load %arg3[%c0_4, %c0_5] : memref<128x128xf32, #tpu.memory_space<vmem>>, vector<128x128xf32>
    %cst_6 = arith.constant dense<0.000000e+00> : vector<128x128xf32>
    %6 = tpu.matmul %4, %5, %cst_6 {dimension_numbers = #tpu.dot_dimension_numbers<[1], [0], [0], [1], [0, 0, 1, 1], [], []>} : vector<128x128xf32>, vector<128x128xf32>, vector<128x128xf32> -> vector<128x128xf32>
    %c0_7 = arith.constant 0 : index
    %c0_8 = arith.constant 0 : index
    %7 = vector.load %arg6[%c0_7, %c0_8] : memref<128x128xf32, #tpu.memory_space<vmem>>, vector<128x128xf32>
    tpu.vector_store %arg6[%c0_7, %c0_8], %6 {strides = array<i32>} : memref<128x128xf32, #tpu.memory_space<vmem>>, vector<128x128xf32>,
    %c0_9 = arith.constant 0 : index
    %c0_10 = arith.constant 0 : index
    %8 = vector.load %arg4[%c0_9, %c0_10] : memref<128x128xf32, #tpu.memory_space<vmem>>, vector<128x128xf32>
    %cst_11 = arith.constant dense<0.000000e+00> : vector<128x128xf32>
    %9 = tpu.matmul %4, %8, %cst_11 {dimension_numbers = #tpu.dot_dimension_numbers<[1], [0], [0], [1], [0, 0, 1, 1], [], []>} : vector<128x128xf32>, vector<128x128xf32>, vector<128x128xf32> -> vector<128x128xf32>
    %c0_12 = arith.constant 0 : index
    %c0_13 = arith.constant 0 : index
    %10 = vector.load %arg5[%c0_12, %c0_13] : memref<128x128xf32, #tpu.memory_space<vmem>>, vector<128x128xf32>
    %cst_14 = arith.constant dense<0.000000e+00> : vector<128x128xf32>
    %11 = tpu.matmul %4, %10, %cst_14 {dimension_numbers = #tpu.dot_dimension_numbers<[1], [0], [0], [1], [0, 0, 1, 1], [], []>} : vector<128x128xf32>, vector<128x128xf32>, vector<128x128xf32> -> vector<128x128xf32>
    %12 = arith.truncf %9 : vector<128x128xf32> to vector<128x128xbf16>
    %c0_15 = arith.constant 0 : index
    %c0_16 = arith.constant 0 : index
    %c0_17 = arith.constant 0 : index
    %13 = vector.load %arg7[%c0_15, %c0_16, %c0_17] : memref<2x128x128xbf16, #tpu.memory_space<vmem>>, vector<1x128x128xbf16>
    %14 = vector.shape_cast %13 : vector<1x128x128xbf16> to vector<128x128xbf16>
    %15 = vector.shape_cast %12 : vector<128x128xbf16> to vector<1x128x128xbf16>
    tpu.vector_store %arg7[%c0_15, %c0_16, %c0_17], %15 {strides = array<i32>} : memref<2x128x128xbf16, #tpu.memory_space<vmem>>, vector<1x128x128xbf16>,
    %16 = arith.truncf %11 : vector<128x128xf32> to vector<128x128xbf16>
    %c1 = arith.constant 1 : index
    %c0_18 = arith.constant 0 : index
    %c0_19 = arith.constant 0 : index
    %17 = vector.load %arg7[%c1, %c0_18, %c0_19] : memref<2x128x128xbf16, #tpu.memory_space<vmem>>, vector<1x128x128xbf16>
    %18 = vector.shape_cast %17 : vector<1x128x128xbf16> to vector<128x128xbf16>
    %19 = vector.shape_cast %16 : vector<128x128xbf16> to vector<1x128x128xbf16>
    tpu.vector_store %arg7[%c1, %c0_18, %c0_19], %19 {strides = array<i32>} : memref<2x128x128xbf16, #tpu.memory_space<vmem>>, vector<1x128x128xbf16>,
    return
  }
  func.func @transform_0(%arg0: i32) -> (i32, i32) {
    %c0_i32 = arith.constant 0 : i32
    %c0_i32_0 = arith.constant 0 : i32
    return %arg0, %c0_i32 : i32, i32
  }
  func.func @transform_1(%arg0: i32) -> (i32, i32) {
    %c0_i32 = arith.constant 0 : i32
    %c0_i32_0 = arith.constant 0 : i32
    %c0_i32_1 = arith.constant 0 : i32
    return %c0_i32, %c0_i32_0 : i32, i32
  }
  func.func @transform_2(%arg0: i32) -> (i32, i32) {
    %c0_i32 = arith.constant 0 : i32
    %c0_i32_0 = arith.constant 0 : i32
    %c0_i32_1 = arith.constant 0 : i32
    return %c0_i32, %c0_i32_0 : i32, i32
  }
  func.func @transform_3(%arg0: i32) -> (i32, i32) {
    %c0_i32 = arith.constant 0 : i32
    %c0_i32_0 = arith.constant 0 : i32
    %c0_i32_1 = arith.constant 0 : i32
    return %c0_i32, %c0_i32_0 : i32, i32
  }
  func.func @transform_4(%arg0: i32) -> (i32, i32) {
    %c0_i32 = arith.constant 0 : i32
    %c0_i32_0 = arith.constant 0 : i32
    %c0_i32_1 = arith.constant 0 : i32
    return %c0_i32, %c0_i32_0 : i32, i32
  }
  func.func @transform_5(%arg0: i32) -> (i32, i32) {
    %c0_i32 = arith.constant 0 : i32
    %c0_i32_0 = arith.constant 0 : i32
    return %arg0, %c0_i32 : i32, i32
  }
  func.func @transform_6(%arg0: i32) -> (i32, i32, i32) {
    %c0_i32 = arith.constant 0 : i32
    %c0_i32_0 = arith.constant 0 : i32
    %c0_i32_1 = arith.constant 0 : i32
    return %c0_i32, %arg0, %c0_i32_0 : i32, i32, i32
  }
}

</mosaic_0001>

<bundles_post_ra>
// kernel: tpu_custom_call.1
= control target key start
LH: loop header
LB: loop body
LE: loop exit
PB: predicated region body
PF: predicated region fallthrough
CT: control target
= control target key end

     0   :  { %12 = vsyncpa [#allocation3], 0  ;;  %s1823_s0 = inlined_call_operand.vmem [shape: f32[128,16], index: 0, kind: input, shape index: {}]   ;;  %s1824_s1 = inlined_call_operand.vmem [shape: f32[16,128], index: 1, kind: input, shape index: {}]   ;;  %s1825_s2 = inlined_call_operand.vmem [shape: f32[128,128], index: 2, kind: input, shape index: {}]   ;;  %s1826_s3 = inlined_call_operand.hbm [shape: f32[128,128], index: 3, kind: input, shape index: {}]   ;;  %s1827_s4 = inlined_call_operand.hbm [shape: f32[128,128], index: 4, kind: input, shape index: {}]   ;;  %s1828_s5 = inlined_call_operand.hbm [shape: f32[128,128], index: 5, kind: output, shape index: {0}]   ;;  %s1829_s6 = inlined_call_operand.hbm [shape: bf16[2,128,128], index: 6, kind: output, shape index: {1}]  }
   0x1   :  { %13 = vsyncpa [#allocation6], 0 }
   0x2   :  { %14 = vsyncpa [#allocation4], 0 }
   0x3   :  { %15 = vsyncpa [#allocation9], 0  ;;  %s1586_s21 = smov [#allocation2]  }
   0x4   :  { %s27_s22 = sshll.u32 %s1586_s21, 4  ;;  %s28_s22 = int_to_ptr.vmem [resolvable:$true] %s27_s22 }
   0x5   :  { %s1506_s23 = scalar_lea.vmem %s28_s22, 2048  ;;  %p1511_p1 = scmp.lt.s32.totalorder %s28_s22, %s28_s22 }
   0x6   :  { %p1507_p0 = scmp.ne.s32.totalorder %s28_s22, %s1506_s23  ;;  %p1512_p2 = scmp.lt.s32.totalorder %s1506_s23, %s1506_s23 }
   0x8   :  { %p1513_p3 = por %p1512_p2, %p1511_p1 }
   0xa   :  { %p1514_p4 = pnand %p1513_p3, %p1507_p0 }
   0xc   :  { %1517 = shalt.err (!%p1514_p4)
}
   0xd   :  { %s1587_s24 = smov 128   ;;  %s1588_s25 = smov 8  }
   0xe   :  { %33 = dma.hbm_to_vmem [thread:$0]  %s1826_s3, 2048, %s28_s22, [#allocation3], %s1587_s24, %s1587_s24, %s1588_s25  }
   0xf   :  { %s1589_s28 = smov [#allocation5]  }
  0x10   :  { %s39_s29 = sshll.u32 %s1589_s28, 4  ;;  %s40_s29 = int_to_ptr.vmem [resolvable:$true] %s39_s29 }
  0x11   :  { %s1526_s30 = scalar_lea.vmem %s40_s29, 2048  ;;  %p1531_p6 = scmp.lt.s32.totalorder %s40_s29, %s40_s29 }
  0x12   :  { %p1527_p5 = scmp.ne.s32.totalorder %s40_s29, %s1526_s30  ;;  %p1532_p7 = scmp.lt.s32.totalorder %s1526_s30, %s1526_s30 }
  0x14   :  { %p1533_p8 = por %p1532_p7, %p1531_p6 }
  0x16   :  { %p1534_p9 = pnand %p1533_p8, %p1527_p5 }
  0x18   :  { %1537 = shalt.err (!%p1534_p9)
}
  0x19   :  { %45 = dma.hbm_to_vmem [thread:$0]  %s1827_s4, 2048, %s40_s29, [#allocation6], %s1587_s24, %s1587_s24, %s1588_s25  }
  0x1a   :  { %1578 = dma.done.wait [#allocation3], 2048  }
  0x1b   :  { %1579 = vsyncadd [#allocation3], 4294965248 }
  0x1c   :  { %1580 = dma.done.wait [#allocation6], 2048  }
  0x1d   :  { %1581 = vsyncadd [#allocation6], 4294965248  ;;  %vm70_vm0 = vcmask 130048   ;;  %v69_v0 = vld [vmem:[%s1824_s1 + $0x8] sm:$0xff]  ;;  %v68_v1 = vld [vmem:[%s1824_s1] sm:$0xff] }
  0x1e   :  { %v52_v2 = vld [vmem:[%s1823_s0] sm:$0xff]  ;;  %1262 = vmatprep.subr.mxu0 %v69_v0  ;;  %v53_v3 = vld [vmem:[%s1823_s0 + $0x8] sm:$0xff]  ;;  %v54_v4 = vld [vmem:[%s1823_s0 + $0x10] sm:$0xff] }
  0x1f   :  { %1266 = vmatprep.mubr.msk.f32.mxu0 %vm70_vm0, %v52_v2  ;;  %1263 = vmatpush3.msra.mxu0 %v69_v0  ;;  %v55_v5 = vld [vmem:[%s1823_s0 + $0x18] sm:$0xff]  ;;  %v294_v8 = vld [vmem:[%s1825_s2 + $0x70] sm:$0xff]  ;;  %v56_v9 = vld [vmem:[%s1823_s0 + $0x20] sm:$0xff] }
  0x20   :  { %1264 = vmatprep.subr.mxu0 %v68_v1  ;;  %v295_v6 = vld [vmem:[%s1825_s2 + $0x78] sm:$0xff]  ;;  %v471_v10 = vld [vmem:[#allocation2 + $0x70] sm:$0xff]  ;;  %v293_v11 = vld [vmem:[%s1825_s2 + $0x68] sm:$0xff] }
  0x21   :  { %1265 = vmatpush3.msra.mxu0 %v68_v1  ;;  %v472_v7 = vld [vmem:[#allocation2 + $0x78] sm:$0xff]  ;;  %1290 = vmatprep.subr.mxu1 %v295_v6  ;;  %v57_v12 = vld [vmem:[%s1823_s0 + $0x28] sm:$0xff]  ;;  %v58_v14 = vld [vmem:[%s1823_s0 + $0x30] sm:$0xff] }
  0x22   :  { %1267 = vmatmul.mubr.msk.f32.vlgmr.msra.gmra.mxu0 %vm70_vm0, %v53_v3  ;;  %1346 = vmatprep.subr.mxu0 %v472_v7  ;;  %v470_v13 = vld [vmem:[#allocation2 + $0x68] sm:$0xff]  ;;  %v292_v15 = vld [vmem:[%s1825_s2 + $0x60] sm:$0xff]  ;;  %v291_v17 = vld [vmem:[%s1825_s2 + $0x58] sm:$0xff] }
  0x23   :  { %1269 = vmatprep.mubr.msk.f32.mxu0 %vm70_vm0, %v54_v4  ;;  %1291 = vmatpush3.msra.mxu1 %v295_v6  ;;  %v469_v16 = vld [vmem:[#allocation2 + $0x60] sm:$0xff]  ;;  %v59_v18 = vld [vmem:[%s1823_s0 + $0x38] sm:$0xff]  ;;  %v290_v21 = vld [vmem:[%s1825_s2 + $0x50] sm:$0xff] }
  0x24   :  { %1347 = vmatpush3.msra.mxu0 %v472_v7  ;;  %1292 = vmatprep.subr.mxu1 %v294_v8  ;;  %v60_v19 = vld [vmem:[%s1823_s0 + $0x40] sm:$0xff]  ;;  %v468_v20 = vld [vmem:[#allocation2 + $0x58] sm:$0xff]  ;;  %v61_v22 = vld [vmem:[%s1823_s0 + $0x48] sm:$0xff] }
  0x25   :  { %1293 = vmatpush3.msra.mxu1 %v294_v8  ;;  %1348 = vmatprep.subr.mxu0 %v471_v10  ;;  %v467_v23 = vld [vmem:[#allocation2 + $0x50] sm:$0xff]  ;;  %v289_v25 = vld [vmem:[%s1825_s2 + $0x48] sm:$0xff]  ;;  %v288_v27 = vld [vmem:[%s1825_s2 + $0x40] sm:$0xff] }
  0x26   :  { %1270 = vmatmul.mubr.msk.f32.gmra.mxu0 %vm70_vm0, %v55_v5  ;;  %1294 = vmatprep.subr.mxu1 %v293_v11  ;;  %v62_v24 = vld [vmem:[%s1823_s0 + $0x50] sm:$0xff]  ;;  %v466_v26 = vld [vmem:[#allocation2 + $0x48] sm:$0xff]  ;;  %v63_v28 = vld [vmem:[%s1823_s0 + $0x58] sm:$0xff] }
  0x27   :  { %1272 = vmatprep.mubr.msk.f32.mxu0 %vm70_vm0, %v56_v9  ;;  %1349 = vmatpush3.msra.mxu0 %v471_v10  ;;  %v64_v29 = vld [vmem:[%s1823_s0 + $0x60] sm:$0xff]  ;;  %v287_v31 = vld [vmem:[%s1825_s2 + $0x38] sm:$0xff]  ;;  %v65_v32 = vld [vmem:[%s1823_s0 + $0x68] sm:$0xff] }
  0x28   :  { %1295 = vmatpush3.msra.mxu1 %v293_v11  ;;  %1350 = vmatprep.subr.mxu0 %v470_v13  ;;  %v465_v30 = vld [vmem:[#allocation2 + $0x40] sm:$0xff]  ;;  %v464_v33 = vld [vmem:[#allocation2 + $0x38] sm:$0xff]  ;;  %v66_v34 = vld [vmem:[%s1823_s0 + $0x70] sm:$0xff] }
  0x29   :  { %1296 = vmatprep.subr.mxu1 %v292_v15  ;;  %1351 = vmatpush3.msra.mxu0 %v470_v13  ;;  %v286_v35 = vld [vmem:[%s1825_s2 + $0x30] sm:$0xff]  ;;  %v285_v37 = vld [vmem:[%s1825_s2 + $0x28] sm:$0xff]  ;;  %v67_v38 = vld [vmem:[%s1823_s0 + $0x78] sm:$0xff] }
  0x2a   :  { %1273 = vmatmul.mubr.msk.f32.gmra.mxu0 %vm70_vm0, %v57_v12  ;;  %1297 = vmatpush3.msra.mxu1 %v292_v15  ;;  %v463_v36 = vld [vmem:[#allocation2 + $0x30] sm:$0xff]  ;;  %v284_v39 = vld [vmem:[%s1825_s2 + $0x20] sm:$0xff]  ;;  %v462_v40 = vld [vmem:[#allocation2 + $0x28] sm:$0xff] }
  0x2b   :  { %1275 = vmatprep.mubr.msk.f32.mxu0 %vm70_vm0, %v58_v14  ;;  %1352 = vmatprep.subr.mxu0 %v469_v16  ;;  %v283_v41 = vld [vmem:[%s1825_s2 + $0x18] sm:$0xff]  ;;  %v461_v42 = vld [vmem:[#allocation2 + $0x20] sm:$0xff]  ;;  %v282_v43 = vld [vmem:[%s1825_s2 + $0x10] sm:$0xff] }
  0x2c   :  { %1298 = vmatprep.subr.mxu1 %v291_v17  ;;  %1353 = vmatpush3.msra.mxu0 %v469_v16  ;;  %v460_v44 = vld [vmem:[#allocation2 + $0x18] sm:$0xff]  ;;  %v459_v45 = vld [vmem:[#allocation2 + $0x10] sm:$0xff]  ;;  %v281_v46 = vld [vmem:[%s1825_s2 + $0x8] sm:$0xff] }
  0x2d   :  { %1299 = vmatpush3.msra.mxu1 %v291_v17  ;;  %1354 = vmatprep.subr.mxu0 %v468_v20  ;;  %v458_v47 = vld [vmem:[#allocation2 + $0x8] sm:$0xff]  ;;  %v280_v48 = vld [vmem:[%s1825_s2] sm:$0xff]  ;;  %v633_v50 = vld [vmem:[#allocation5 + $0x78] sm:$0xff]  ;;  %s1590_s2 = smov [#allocation7]  }
  0x2e   :  { %1276 = vmatmul.mubr.msk.f32.gmra.mxu0 %vm70_vm0, %v59_v18  ;;  %1300 = vmatprep.subr.mxu1 %v290_v21  ;;  %v457_v49 = vld [vmem:[#allocation2] sm:$0xff]  ;;  %v632_v56 = vld [vmem:[#allocation5 + $0x70] sm:$0xff]  ;;  %v631_v60 = vld [vmem:[#allocation5 + $0x68] sm:$0xff]  ;;  %s945_s23 = sshll.u32 %s1590_s2, 4  ;;  %s946_s23 = int_to_ptr.vmem [resolvable:$true] %s945_s23 }
  0x2f   :  { %1278 = vmatprep.mubr.msk.f32.mxu0 %vm70_vm0, %v60_v19  ;;  %1355 = vmatpush3.msra.mxu0 %v468_v20  ;;  %v630_v0 = vld [vmem:[#allocation5 + $0x60] sm:$0xff]  ;;  %v629_v2 = vld [vmem:[#allocation5 + $0x58] sm:$0xff]  ;;  %v628_v7 = vld [vmem:[#allocation5 + $0x50] sm:$0xff]  ;;  %s1538_s26 = scalar_lea.vmem %s946_s23, 2048  ;;  %p1543_p11 = scmp.lt.s32.totalorder %s946_s23, %s946_s23 }
  0x30   :  { %1301 = vmatpush3.msra.mxu1 %v290_v21  ;;  %1356 = vmatprep.subr.mxu0 %v467_v23  ;;  %v627_v9 = vld [vmem:[#allocation5 + $0x48] sm:$0xff]  ;;  %v626_v14 = vld [vmem:[#allocation5 + $0x40] sm:$0xff]  ;;  %v625_v15 = vld [vmem:[#allocation5 + $0x38] sm:$0xff]  ;;  %p1539_p10 = scmp.ne.s32.totalorder %s946_s23, %s1538_s26  ;;  %p1544_p12 = scmp.lt.s32.totalorder %s1538_s26, %s1538_s26 }
  0x31   :  { %1302 = vmatprep.subr.mxu1 %v289_v25  ;;  %1357 = vmatpush3.msra.mxu0 %v467_v23  ;;  %v624_v19 = vld [vmem:[#allocation5 + $0x30] sm:$0xff]  ;;  %v623_v21 = vld [vmem:[#allocation5 + $0x28] sm:$0xff] }
  0x32   :  { %1279 = vmatmul.mubr.msk.f32.gmra.mxu0 %vm70_vm0, %v61_v22  ;;  %1303 = vmatpush3.msra.mxu1 %v289_v25  ;;  %v622_v25 = vld [vmem:[#allocation5 + $0x20] sm:$0xff]  ;;  %p1545_p13 = por %p1544_p12, %p1543_p11 }
  0x33   :  { %1281 = vmatprep.mubr.msk.f32.mxu0 %vm70_vm0, %v62_v24  ;;  %1358 = vmatprep.subr.mxu0 %v466_v26 }
  0x34   :  { %1304 = vmatprep.subr.mxu1 %v288_v27  ;;  %1359 = vmatpush3.msra.mxu0 %v466_v26  ;;  %v621_v26 = vld [vmem:[#allocation5 + $0x18] sm:$0xff]  ;;  %p1546_p0 = pnand %p1545_p13, %p1539_p10 }
  0x35   :  { %1305 = vmatpush3.msra.mxu1 %v288_v27  ;;  %1360 = vmatprep.subr.mxu0 %v465_v30 }
  0x36   :  { %1282 = vmatmul.mubr.msk.f32.gmra.mxu0 %vm70_vm0, %v63_v28  ;;  %1306 = vmatprep.subr.mxu1 %v287_v31 }
  0x37   :  { %1284 = vmatprep.mubr.msk.f32.mxu0 %vm70_vm0, %v64_v29  ;;  %1361 = vmatpush3.msra.mxu0 %v465_v30  ;;  %v620_v30 = vld [vmem:[#allocation5 + $0x10] sm:$0xff] }
  0x38   :  { %1307 = vmatpush3.msra.mxu1 %v287_v31  ;;  %1362 = vmatprep.subr.mxu0 %v464_v33  ;;  %v619_v31 = vld [vmem:[#allocation5 + $0x8] sm:$0xff] }
  0x39   :  { %1308 = vmatprep.subr.mxu1 %v286_v35  ;;  %1363 = vmatpush3.msra.mxu0 %v464_v33  ;;  %v618_v33 = vld [vmem:[#allocation5] sm:$0xff] }
  0x3a   :  { %1285 = vmatmul.mubr.msk.f32.gmra.mxu0 %vm70_vm0, %v65_v32  ;;  %1309 = vmatpush3.msra.mxu1 %v286_v35 }
  0x3b   :  { %1287 = vmatprep.mubr.msk.f32.mxu0 %vm70_vm0, %v66_v34  ;;  %1364 = vmatprep.subr.mxu0 %v463_v36 }
  0x3c   :  { %1310 = vmatprep.subr.mxu1 %v285_v37  ;;  %1365 = vmatpush3.msra.mxu0 %v463_v36 }
  0x3d   :  { %1311 = vmatpush3.msra.mxu1 %v285_v37  ;;  %1366 = vmatprep.subr.mxu0 %v462_v40 }
  0x3e   :  { %1288 = vmatmul.mubr.msk.f32.gmra.mxu0 %vm70_vm0, %v67_v38  ;;  %1312 = vmatprep.subr.mxu1 %v284_v39 }
  0x3f   :  { %1313 = vmatpush3.msra.mxu1 %v284_v39  ;;  %1367 = vmatpush3.msra.mxu0 %v462_v40 }
  0x40   :  { %1314 = vmatprep.subr.mxu1 %v283_v41  ;;  %1368 = vmatprep.subr.mxu0 %v461_v42 }
  0x41   :  { %1315 = vmatpush3.msra.mxu1 %v283_v41  ;;  %1369 = vmatpush3.msra.mxu0 %v461_v42 }
  0x42   :  { %1316 = vmatprep.subr.mxu1 %v282_v43  ;;  %1370 = vmatprep.subr.mxu0 %v460_v44 }
  0x43   :  { %1317 = vmatpush3.msra.mxu1 %v282_v43  ;;  %1371 = vmatpush3.msra.mxu0 %v460_v44 }
  0x44   :  { %1372 = vmatprep.subr.mxu0 %v459_v45  ;;  %1318 = vmatprep.subr.mxu1 %v281_v46 }
  0x45   :  { %1373 = vmatpush3.msra.mxu0 %v459_v45  ;;  %1319 = vmatpush3.msra.mxu1 %v281_v46 }
  0x46   :  { %1374 = vmatprep.subr.mxu0 %v458_v47  ;;  %1320 = vmatprep.subr.mxu1 %v280_v48 }
  0x47   :  { %1375 = vmatpush3.msra.mxu0 %v458_v47  ;;  %1321 = vmatpush3.msra.mxu1 %v280_v48 }
  0x48   :  { %1376 = vmatprep.subr.mxu0 %v457_v49  ;;  %1458 = vmatprep.subr.mxu1 %v633_v50 }
  0x49   :  { %1377 = vmatpush3.msra.mxu0 %v457_v49 }
  0x4a   :  { %1402 = vmatprep.subr.mxu0 %v633_v50 }
  0xe2   :  { %v1268_v51 = vpop.f32.mrf.mxu0 }
  0xe3   :  { %v1761_v54 = vmax.f32 %v1268_v51, 0.0 }
  0xe4   :  { %v185_v52 = vpop.f32.mrf.mxu0 }
  0xe5   :  { %v1759_v53 = vmax.f32 %v185_v52, 0.0 }
  0xe6   :  { %v1271_v55 = vpop.f32.mrf.mxu0 }
  0xe7   :  { %1322 = vmatprep.mubr.f32.mxu1 %v1759_v53  ;;  %1378 = vmatprep.mubr.f32.mxu0 %v1759_v53  ;;  %v1769_v61 = vmax.f32 %v1271_v55, 0.0 }
  0xe8   :  { %v195_v57 = vpop.f32.mrf.mxu0  ;;  %1323 = vmatmul.mubr.f32.vlgmr.msra.gmra.mxu1 %v1761_v54  ;;  %1379 = vmatmul.mubr.f32.vlgmr.msra.gmra.mxu0 %v1761_v54 }
  0xe9   :  { %v1767_v58 = vmax.f32 %v195_v57, 0.0  ;;  %1474 = vmatpush3.msra.mxu1 %v633_v50  ;;  %1403 = vmatpush3.msra.mxu0 %v633_v50 }
  0xea   :  { %1459 = vmatprep.subr.mxu1 %v632_v56  ;;  %v1274_v59 = vpop.f32.mrf.mxu0  ;;  %1404 = vmatprep.subr.mxu0 %v632_v56 }
  0xeb   :  { %1475 = vmatpush3.msra.mxu1 %v632_v56  ;;  %1325 = vmatprep.mubr.f32.mxu1 %v1767_v58  ;;  %v1777_v4 = vmax.f32 %v1274_v59, 0.0 }
  0xec   :  { %1381 = vmatprep.mubr.f32.mxu0 %v1767_v58  ;;  %1405 = vmatpush3.msra.mxu0 %v632_v56  ;;  %v205_v62 = vpop.f32.mrf.mxu0 }
  0xed   :  { %1460 = vmatprep.subr.mxu1 %v631_v60  ;;  %v1773_v63 = vmax.f32 %v205_v62, 0.0  ;;  %1326 = vmatmul.mubr.f32.gmra.mxu1 %v1769_v61 }
  0xee   :  { %1382 = vmatmul.mubr.f32.gmra.mxu0 %v1769_v61  ;;  %1406 = vmatprep.subr.mxu0 %v631_v60  ;;  %v1277_v1 = vpop.f32.mrf.mxu0 }
  0xef   :  { %1476 = vmatpush3.msra.mxu1 %v631_v60  ;;  %1407 = vmatpush3.msra.mxu0 %v631_v60  ;;  %v1785_v11 = vmax.f32 %v1277_v1, 0.0 }
  0xf0   :  { %1461 = vmatprep.subr.mxu1 %v630_v0  ;;  %1408 = vmatprep.subr.mxu0 %v630_v0  ;;  %v215_v3 = vpop.f32.mrf.mxu0 }
  0xf1   :  { %1477 = vmatpush3.msra.mxu1 %v630_v0  ;;  %1328 = vmatprep.mubr.f32.mxu1 %v1773_v63  ;;  %v1781_v6 = vmax.f32 %v215_v3, 0.0 }
  0xf2   :  { %1384 = vmatprep.mubr.f32.mxu0 %v1773_v63  ;;  %1409 = vmatpush3.msra.mxu0 %v630_v0  ;;  %v1280_v5 = vpop.f32.mrf.mxu0 }
  0xf3   :  { %1462 = vmatprep.subr.mxu1 %v629_v2  ;;  %1329 = vmatmul.mubr.f32.gmra.mxu1 %v1777_v4  ;;  %v1793_v17 = vmax.f32 %v1280_v5, 0.0 }
  0xf4   :  { %1385 = vmatmul.mubr.f32.gmra.mxu0 %v1777_v4  ;;  %1410 = vmatprep.subr.mxu0 %v629_v2  ;;  %v225_v8 = vpop.f32.mrf.mxu0 }
  0xf5   :  { %1478 = vmatpush3.msra.mxu1 %v629_v2  ;;  %1411 = vmatpush3.msra.mxu0 %v629_v2  ;;  %v1789_v13 = vmax.f32 %v225_v8, 0.0 }
  0xf6   :  { %1463 = vmatprep.subr.mxu1 %v628_v7  ;;  %1412 = vmatprep.subr.mxu0 %v628_v7  ;;  %v1283_v10 = vpop.f32.mrf.mxu0 }
  0xf7   :  { %1479 = vmatpush3.msra.mxu1 %v628_v7  ;;  %1331 = vmatprep.mubr.f32.mxu1 %v1781_v6  ;;  %v275_v22 = vmax.f32 %v1283_v10, 0.0 }
  0xf8   :  { %1387 = vmatprep.mubr.f32.mxu0 %v1781_v6  ;;  %1413 = vmatpush3.msra.mxu0 %v628_v7  ;;  %v235_v12 = vpop.f32.mrf.mxu0 }
  0xf9   :  { %1464 = vmatprep.subr.mxu1 %v627_v9  ;;  %1332 = vmatmul.mubr.f32.gmra.mxu1 %v1785_v11  ;;  %v1797_v18 = vmax.f32 %v235_v12, 0.0 }
  0xfa   :  { %1388 = vmatmul.mubr.f32.gmra.mxu0 %v1785_v11  ;;  %1414 = vmatprep.subr.mxu0 %v627_v9  ;;  %v1286_v16 = vpop.f32.mrf.mxu0 }
  0xfb   :  { %1480 = vmatpush3.msra.mxu1 %v627_v9  ;;  %1415 = vmatpush3.msra.mxu0 %v627_v9  ;;  %v277_v28 = vmax.f32 %v1286_v16, 0.0 }
  0xfc   :  { %1465 = vmatprep.subr.mxu1 %v626_v14  ;;  %1416 = vmatprep.subr.mxu0 %v626_v14  ;;  %v245_v20 = vpop.f32.mrf.mxu0 }
  0xfd   :  { %1481 = vmatpush3.msra.mxu1 %v626_v14  ;;  %1334 = vmatprep.mubr.f32.mxu1 %v1789_v13  ;;  %v276_v24 = vmax.f32 %v245_v20, 0.0 }
  0xfe   :  { %1390 = vmatprep.mubr.f32.mxu0 %v1789_v13  ;;  %1417 = vmatpush3.msra.mxu0 %v626_v14  ;;  %v1289_v23 = vpop.f32.mrf.mxu0 }
  0xff   :  { %1466 = vmatprep.subr.mxu1 %v625_v15  ;;  %1335 = vmatmul.mubr.f32.gmra.mxu1 %v1793_v17  ;;  %v279_v32 = vmax.f32 %v1289_v23, 0.0 }
 0x100   :  { %1391 = vmatmul.mubr.f32.gmra.mxu0 %v1793_v17  ;;  %1418 = vmatprep.subr.mxu0 %v625_v15  ;;  %v255_v27 = vpop.f32.mrf.mxu0 }
 0x101   :  { %1482 = vmatpush3.msra.mxu1 %v625_v15  ;;  %1419 = vmatpush3.msra.mxu0 %v625_v15  ;;  %v278_v29 = vmax.f32 %v255_v27, 0.0 }
 0x102   :  { %1467 = vmatprep.subr.mxu1 %v624_v19  ;;  %1420 = vmatprep.subr.mxu0 %v624_v19 }
 0x103   :  { %1483 = vmatpush3.msra.mxu1 %v624_v19  ;;  %1337 = vmatprep.mubr.f32.mxu1 %v1797_v18 }
 0x104   :  { %1393 = vmatprep.mubr.f32.mxu0 %v1797_v18  ;;  %1421 = vmatpush3.msra.mxu0 %v624_v19 }
 0x105   :  { %1468 = vmatprep.subr.mxu1 %v623_v21  ;;  %1338 = vmatmul.mubr.f32.gmra.mxu1 %v275_v22 }
 0x106   :  { %1394 = vmatmul.mubr.f32.gmra.mxu0 %v275_v22  ;;  %1422 = vmatprep.subr.mxu0 %v623_v21 }
 0x107   :  { %1484 = vmatpush3.msra.mxu1 %v623_v21  ;;  %1423 = vmatpush3.msra.mxu0 %v623_v21 }
 0x108   :  { %1469 = vmatprep.subr.mxu1 %v622_v25  ;;  %1424 = vmatprep.subr.mxu0 %v622_v25 }
 0x109   :  { %1485 = vmatpush3.msra.mxu1 %v622_v25  ;;  %1340 = vmatprep.mubr.f32.mxu1 %v276_v24 }
 0x10a   :  { %1396 = vmatprep.mubr.f32.mxu0 %v276_v24  ;;  %1425 = vmatpush3.msra.mxu0 %v622_v25 }
 0x10b   :  { %1470 = vmatprep.subr.mxu1 %v621_v26  ;;  %1341 = vmatmul.mubr.f32.gmra.mxu1 %v277_v28 }
 0x10c   :  { %1397 = vmatmul.mubr.f32.gmra.mxu0 %v277_v28  ;;  %1426 = vmatprep.subr.mxu0 %v621_v26 }
 0x10d   :  { %1486 = vmatpush3.msra.mxu1 %v621_v26  ;;  %1427 = vmatpush3.msra.mxu0 %v621_v26 }
 0x10e   :  { %1471 = vmatprep.subr.mxu1 %v620_v30  ;;  %1428 = vmatprep.subr.mxu0 %v620_v30 }
 0x10f   :  { %1487 = vmatpush3.msra.mxu1 %v620_v30  ;;  %1343 = vmatprep.mubr.f32.mxu1 %v278_v29 }
 0x110   :  { %1399 = vmatprep.mubr.f32.mxu0 %v278_v29  ;;  %1429 = vmatpush3.msra.mxu0 %v620_v30 }
 0x111   :  { %1472 = vmatprep.subr.mxu1 %v619_v31  ;;  %1344 = vmatmul.mubr.f32.gmra.mxu1 %v279_v32 }
 0x112   :  { %1400 = vmatmul.mubr.f32.gmra.mxu0 %v279_v32  ;;  %1430 = vmatprep.subr.mxu0 %v619_v31 }
 0x113   :  { %1488 = vmatpush3.msra.mxu1 %v619_v31  ;;  %1431 = vmatpush3.msra.mxu0 %v619_v31 }
 0x114   :  { %1473 = vmatprep.subr.mxu1 %v618_v33  ;;  %1434 = vmatprep.mubr.f32.mxu0 %v1759_v53 }
 0x115   :  { %1443 = vmatprep.mubr.f32.mxu1 %v1781_v6  ;;  %1432 = vmatprep.subr.mxu0 %v618_v33 }
 0x116   :  { %1489 = vmatpush3.msra.mxu1 %v618_v33  ;;  %1433 = vmatpush3.msra.mxu0 %v618_v33 }
 0x117   :  { %1435 = vmatmul.mubr.f32.vlgmr.msra.gmra.mxu0 %v1761_v54  ;;  %1444 = vmatmul.mubr.f32.vlgmr.msra.gmra.mxu1 %v1785_v11 }
 0x118   :  { %1437 = vmatprep.mubr.f32.mxu0 %v1767_v58  ;;  %1446 = vmatprep.mubr.f32.mxu1 %v1789_v13 }
 0x11b   :  { %1438 = vmatmul.mubr.f32.gmra.mxu0 %v1769_v61  ;;  %1447 = vmatmul.mubr.f32.gmra.mxu1 %v1793_v17 }
 0x11c   :  { %1440 = vmatprep.mubr.f32.mxu0 %v1773_v63  ;;  %1449 = vmatprep.mubr.f32.mxu1 %v1797_v18 }
 0x11f   :  { %1441 = vmatmul.mubr.f32.gmra.mxu0 %v1777_v4  ;;  %1450 = vmatmul.mubr.f32.gmra.mxu1 %v275_v22 }
 0x120   :  { %1452 = vmatprep.mubr.f32.mxu1 %v276_v24 }
 0x123   :  { %1453 = vmatmul.mubr.f32.gmra.mxu1 %v277_v28 }
 0x124   :  { %1455 = vmatprep.mubr.f32.mxu1 %v278_v29 }
 0x127   :  { %1456 = vmatmul.mubr.f32.gmra.mxu1 %v279_v32 }
 0x1a8   :  { %v1324_v34 = vpop.f32.mrf.mxu1  ;;  %v1380_v35 = vpop.f32.mrf.mxu0 }
 0x1a9   :  { %442 = vst [vmem:[#allocation7 + $0x8] sm:$0xff] %v1324_v34 }
 0x1aa   :  { %v362_v36 = vpop.f32.mrf.mxu1  ;;  %v539_v37 = vpop.f32.mrf.mxu0 }
 0x1ab   :  { %441 = vst [vmem:[#allocation7] sm:$0xff] %v362_v36  ;;  %v1057_v38 = vpack.c.bf16 %v1380_v35, %v539_v37 }
 0x1ad   :  { %1058 = vst [vmem:[#allocation8] sm:$0xff] %v1057_v38   ;;  %v1327_v39 = vpop.f32.mrf.mxu1 }
 0x1ae   :  { %444 = vst [vmem:[#allocation7 + $0x18] sm:$0xff] %v1327_v39  ;;  %v1383_v40 = vpop.f32.mrf.mxu0 }
 0x1af   :  { %v372_v41 = vpop.f32.mrf.mxu1 }
 0x1b0   :  { %443 = vst [vmem:[#allocation7 + $0x10] sm:$0xff] %v372_v41  ;;  %v549_v42 = vpop.f32.mrf.mxu0 }
 0x1b1   :  { %v1062_v43 = vpack.c.bf16 %v1383_v40, %v549_v42 }
 0x1b3   :  { %1134 = vst [vmem:[#allocation8 + $0x8] sm:$0xff] %v1062_v43   ;;  %v1330_v44 = vpop.f32.mrf.mxu1 }
 0x1b4   :  { %446 = vst [vmem:[#allocation7 + $0x28] sm:$0xff] %v1330_v44  ;;  %v1386_v45 = vpop.f32.mrf.mxu0 }
 0x1b5   :  { %v382_v46 = vpop.f32.mrf.mxu1 }
 0x1b6   :  { %445 = vst [vmem:[#allocation7 + $0x20] sm:$0xff] %v382_v46  ;;  %v559_v47 = vpop.f32.mrf.mxu0 }
 0x1b7   :  { %v1067_v48 = vpack.c.bf16 %v1386_v45, %v559_v47 }
 0x1b9   :  { %1135 = vst [vmem:[#allocation8 + $0x10] sm:$0xff] %v1067_v48   ;;  %v1333_v49 = vpop.f32.mrf.mxu1 }
 0x1ba   :  { %448 = vst [vmem:[#allocation7 + $0x38] sm:$0xff] %v1333_v49  ;;  %v1389_v50 = vpop.f32.mrf.mxu0 }
 0x1bb   :  { %v392_v51 = vpop.f32.mrf.mxu1 }
 0x1bc   :  { %447 = vst [vmem:[#allocation7 + $0x30] sm:$0xff] %v392_v51  ;;  %v569_v52 = vpop.f32.mrf.mxu0 }
 0x1bd   :  { %v1072_v53 = vpack.c.bf16 %v1389_v50, %v569_v52 }
 0x1bf   :  { %1136 = vst [vmem:[#allocation8 + $0x18] sm:$0xff] %v1072_v53   ;;  %v1336_v54 = vpop.f32.mrf.mxu1 }
 0x1c0   :  { %450 = vst [vmem:[#allocation7 + $0x48] sm:$0xff] %v1336_v54  ;;  %v1392_v55 = vpop.f32.mrf.mxu0 }
 0x1c1   :  { %v402_v56 = vpop.f32.mrf.mxu1 }
 0x1c2   :  { %449 = vst [vmem:[#allocation7 + $0x40] sm:$0xff] %v402_v56  ;;  %v579_v57 = vpop.f32.mrf.mxu0 }
 0x1c3   :  { %v1077_v58 = vpack.c.bf16 %v1392_v55, %v579_v57 }
 0x1c5   :  { %1137 = vst [vmem:[#allocation8 + $0x20] sm:$0xff] %v1077_v58   ;;  %v1339_v59 = vpop.f32.mrf.mxu1 }
 0x1c6   :  { %452 = vst [vmem:[#allocation7 + $0x58] sm:$0xff] %v1339_v59  ;;  %v1395_v60 = vpop.f32.mrf.mxu0 }
 0x1c7   :  { %v412_v61 = vpop.f32.mrf.mxu1 }
 0x1c8   :  { %451 = vst [vmem:[#allocation7 + $0x50] sm:$0xff] %v412_v61  ;;  %v589_v62 = vpop.f32.mrf.mxu0 }
 0x1c9   :  { %v1082_v63 = vpack.c.bf16 %v1395_v60, %v589_v62 }
 0x1cb   :  { %1138 = vst [vmem:[#allocation8 + $0x28] sm:$0xff] %v1082_v63   ;;  %v1342_v0 = vpop.f32.mrf.mxu1 }
 0x1cc   :  { %454 = vst [vmem:[#allocation7 + $0x68] sm:$0xff] %v1342_v0  ;;  %v1398_v1 = vpop.f32.mrf.mxu0 }
 0x1cd   :  { %v422_v2 = vpop.f32.mrf.mxu1 }
 0x1ce   :  { %453 = vst [vmem:[#allocation7 + $0x60] sm:$0xff] %v422_v2  ;;  %v599_v3 = vpop.f32.mrf.mxu0 }
 0x1cf   :  { %v1087_v4 = vpack.c.bf16 %v1398_v1, %v599_v3 }
 0x1d1   :  { %1139 = vst [vmem:[#allocation8 + $0x30] sm:$0xff] %v1087_v4   ;;  %v1345_v5 = vpop.f32.mrf.mxu1 }
 0x1d2   :  { %456 = vst [vmem:[#allocation7 + $0x78] sm:$0xff] %v1345_v5  ;;  %v1401_v6 = vpop.f32.mrf.mxu0 }
 0x1d3   :  { %v432_v7 = vpop.f32.mrf.mxu1 }
 0x1d4   :  { %455 = vst [vmem:[#allocation7 + $0x70] sm:$0xff] %v432_v7  ;;  %v609_v8 = vpop.f32.mrf.mxu0 }
 0x1d5   :  { %v1092_v9 = vpack.c.bf16 %v1401_v6, %v609_v8 }
 0x1d6   :  { %1549 = shalt.err (!%p1546_p0)
}
 0x1d7   :  { %951 = dma.vmem_to_hbm [thread:$0]  %s946_s23, 2048, %s1828_s5, [#allocation4], %s1587_s24, %s1587_s24, %s1588_s25   ;;  %1140 = vst [vmem:[#allocation8 + $0x38] sm:$0xff] %v1092_v9   ;;  %v1436_v10 = vpop.f32.mrf.mxu0  ;;  %v1445_v11 = vpop.f32.mrf.mxu1 }
 0x1d8   :  { %s1591_s5 = smov [#allocation8]  }
 0x1d9   :  { %v700_v12 = vpop.f32.mrf.mxu0  ;;  %v730_v13 = vpop.f32.mrf.mxu1  ;;  %s957_s24 = sshll.u32 %s1591_s5, 4  ;;  %s958_s24 = int_to_ptr.vmem [resolvable:$true] %s957_s24 }
 0x1da   :  { %v1097_v14 = vpack.c.bf16 %v1436_v10, %v700_v12  ;;  %v1112_v15 = vpack.c.bf16 %v1445_v11, %v730_v13  ;;  %s1558_s25 = scalar_lea.vmem %s958_s24, 2048  ;;  %p1563_p2 = scmp.lt.s32.totalorder %s958_s24, %s958_s24 }
 0x1db   :  { %v1439_v16 = vpop.f32.mrf.mxu0  ;;  %v1448_v17 = vpop.f32.mrf.mxu1  ;;  %p1559_p1 = scmp.ne.s32.totalorder %s958_s24, %s1558_s25  ;;  %p1564_p3 = scmp.lt.s32.totalorder %s1558_s25, %s1558_s25 }
 0x1dc   :  { %1098 = vst [vmem:[#allocation8 + $0x40] sm:$0xff] %v1097_v14   ;;  %1143 = vst [vmem:[#allocation8 + $0x58] sm:$0xff] %v1112_v15  }
 0x1dd   :  { %v710_v18 = vpop.f32.mrf.mxu0  ;;  %v740_v19 = vpop.f32.mrf.mxu1  ;;  %p1565_p4 = por %p1564_p3, %p1563_p2 }
 0x1de   :  { %v1102_v20 = vpack.c.bf16 %v1439_v16, %v710_v18  ;;  %v1117_v21 = vpack.c.bf16 %v1448_v17, %v740_v19 }
 0x1df   :  { %v1442_v22 = vpop.f32.mrf.mxu0  ;;  %v1451_v23 = vpop.f32.mrf.mxu1  ;;  %p1566_p5 = pnand %p1565_p4, %p1559_p1 }
 0x1e0   :  { %1141 = vst [vmem:[#allocation8 + $0x48] sm:$0xff] %v1102_v20   ;;  %1144 = vst [vmem:[#allocation8 + $0x60] sm:$0xff] %v1117_v21  }
 0x1e1   :  { %v720_v24 = vpop.f32.mrf.mxu0  ;;  %v750_v25 = vpop.f32.mrf.mxu1 }
 0x1e2   :  { %v1107_v26 = vpack.c.bf16 %v1442_v22, %v720_v24  ;;  %v1122_v27 = vpack.c.bf16 %v1451_v23, %v750_v25 }
 0x1e3   :  { %v1454_v28 = vpop.f32.mrf.mxu1 }
 0x1e4   :  { %1142 = vst [vmem:[#allocation8 + $0x50] sm:$0xff] %v1107_v26   ;;  %1145 = vst [vmem:[#allocation8 + $0x68] sm:$0xff] %v1122_v27  }
 0x1e5   :  { %v760_v29 = vpop.f32.mrf.mxu1 }
 0x1e6   :  { %v1127_v30 = vpack.c.bf16 %v1454_v28, %v760_v29 }
 0x1e7   :  { %v1457_v31 = vpop.f32.mrf.mxu1 }
 0x1e8   :  { %1146 = vst [vmem:[#allocation8 + $0x70] sm:$0xff] %v1127_v30  }
 0x1e9   :  { %v770_v32 = vpop.f32.mrf.mxu1 }
 0x1ea   :  { %v1132_v33 = vpack.c.bf16 %v1457_v31, %v770_v32 }
 0x1ec   :  { %1147 = vst [vmem:[#allocation8 + $0x78] sm:$0xff] %v1132_v33  }
 0x1ed   :  { %1569 = shalt.err (!%p1566_p5)
}
 0x1ee   :  { %s1592_s29 = smov 64   ;;  %s1593_s30 = smov 4  }
 0x1ef   :  { %963 = dma.vmem_to_hbm [thread:$0]  %s958_s24, 2048, %s1829_s6, [#allocation9], %s1592_s29, %s1592_s29, %s1593_s30  }
 0x1f0   :  { %1582 = dma.done.wait [#allocation4], 2048  }
 0x1f1   :  { %1583 = vsyncadd [#allocation4], 4294965248 }
 0x1f2   :  { %1584 = dma.done.wait [#allocation9], 2048  }
 0x1f3   :  { %1585 = vsyncadd [#allocation9], 4294965248 }
 0x1f4   :  { %970 = vsyncpa [#allocation3], 1 }
 0x1f5   :  { %971 = vsyncpa [#allocation6], 1 }
 0x1f6   :  { %972 = vsyncpa [#allocation4], 1 }
 0x1f7   :  { %973 = vsyncpa [#allocation9], 1 }

</bundles_post_ra>
